<compile_context>
chip_gen: v7x
topology: tpu7x:2x2x1
jax: 0.10.0
libtpu: 0.0.40
codegen_flags: <defaults>
</compile_context>

<pallas_src>
from functools import partial

import jax
import jax.numpy as jnp
from jax.experimental import pallas as pl
from jax.experimental.pallas import tpu as pltpu


# ----------------------------- kernel body --------------------------------- #

def _decoder_kernel(x_ref, w1_ref, b1_ref, w2_ref, b2_ref, o_ref, *, tanh_in_bf16):
    # Matmul 1 on the MXU with f32 accumulation; bias add in f32.
    h = jnp.dot(x_ref[...], w1_ref[...], preferred_element_type=jnp.float32)
    h = h + b1_ref[...]
    if tanh_in_bf16:
        # v6e/v7x: bf16-native EUP -> halve the dominant transcendental work and
        # feed the second MXU matmul in bf16 with no extra cast pass.
        h = jnp.tanh(h.astype(jnp.bfloat16))
    else:
        # v5e / strict-f32 path: tanh in f32, then (maybe) cast for the MXU.
        h = jnp.tanh(h).astype(w2_ref.dtype)
    # Matmul 2 (80% of FLOPs) with f32 accumulation; sigmoid in f32 on the
    # small (tb, Fp) output tile.
    y = jnp.dot(h, w2_ref[...], preferred_element_type=jnp.float32) + b2_ref[...]
    o_ref[...] = jax.nn.sigmoid(y).astype(o_ref.dtype)


# ----------------------------- helpers ------------------------------------- #

def _round_up(n, m):
    return ((n + m - 1) // m) * m


def _is_v5_device():
    try:
        kind = jax.devices()[0].device_kind.lower()
    except Exception:
        return False
    return "v5" in kind


def prepare_decoder_params(w1_t, b1, w2_t, b2, *, use_bf16_matmul=True):
    """One-time parameter prep: lane-dense zero padding + pre-transposed layout
    + optional bf16 cast. Hoisted out of the per-call path.

    w1_t: (E, H)  b1: (H,)  w2_t: (H, F)  b2: (F,)   (H = 2000)
    """
    E, H = w1_t.shape
    F = w2_t.shape[1]
    Hp = _round_up(H, 128)                    # 2000 -> 2048
    Fp = _round_up(F, 128)                    # e.g. 64 -> 128

    w1p = jnp.pad(w1_t, ((0, 0), (0, Hp - H)))            # zero cols -> tanh(0)=0
    b1p = jnp.pad(b1, (0, Hp - H)).reshape(1, Hp)
    w2p = jnp.pad(w2_t, ((0, Hp - H), (0, Fp - F)))        # zero rows/cols
    b2p = jnp.pad(b2, (0, Fp - F)).reshape(1, Fp)

    wdtype = jnp.bfloat16 if use_bf16_matmul else jnp.float32
    w1p = w1p.astype(wdtype)
    w2p = w2p.astype(wdtype)
    b1p = b1p.astype(jnp.float32)
    b2p = b2p.astype(jnp.float32)

    return {
        "w1": w1p, "b1": b1p, "w2": w2p, "b2": b2p,
        "E": E, "F": F, "Hp": Hp, "Fp": Fp,
        "use_bf16": use_bf16_matmul,
    }


# ----------------------------- forward wrapper ----------------------------- #

def decoder_forward(x, params, *, block_batch=1024):
    """x: (B, E) -> (B, F). `params` from prepare_decoder_params()."""
    orig_dtype = x.dtype
    B, E = x.shape
    assert E == params["E"], "x feature dim does not match prepared params"
    w1p, b1p, w2p, b2p = params["w1"], params["b1"], params["w2"], params["b2"]
    Hp, Fp, F = params["Hp"], params["Fp"], params["F"]
    use_bf16 = params["use_bf16"]

    # bf16 transcendentals only where the EUP is bf16-native (not v5e) and only
    # on the fast (bf16-matmul) path; f32 path keeps the 1e-5 guarantee.
    tanh_in_bf16 = use_bf16 and not _is_v5_device()

    # ---- batch tile selection (no batch padding; Pallas masks the ragged tail) ----
    if B > 256:
        # At least 2 grid steps so v7x can shard the parallel axis across both TCs;
        # multiple of 128 maps cleanly on v5e's 4x128 MXU as well.
        tb = min(block_batch, _round_up(pl.cdiv(B, 2), 128))
    else:
        tb = min(block_batch, _round_up(B, 8))
    tb = _round_up(tb, 8)
    grid = (pl.cdiv(B, tb),)

    if use_bf16:
        x = x.astype(jnp.bfloat16)   # halves x DMA; matmul1 operands homogeneous

    # ---- right-sized VMEM budget (hidden counted once; weights/bias/x/out 2x-buffered) ----
    wbytes = 2 if use_bf16 else 4
    xbytes = 2 if use_bf16 else 4
    hbytes = 2 if tanh_in_bf16 else 4
    footprint = (
        2 * (E * Hp + Hp * Fp) * wbytes        # resident W1^T, W2^T (double-buffered by default)
        + 2 * (Hp + Fp) * 4                    # biases
        + 2 * tb * E * xbytes                  # double-buffered x tiles
        + 2 * tb * Fp * 4                      # double-buffered out tiles
        + tb * Hp * (hbytes + 4)               # live hidden (+ f32 pre-tanh temp)
    )
    vmem_limit = int(min(max(int(footprint * 1.5), 16 << 20), 40 << 20))

    cost = pl.CostEstimate(
        flops=2 * B * (E * Hp + Hp * Fp),
        transcendentals=B * (Hp + Fp),
        bytes_accessed=(B * E * xbytes + (E * Hp + Hp * Fp) * wbytes
                        + (Hp + Fp) * 4 + B * Fp * 4),
    )

    out = pl.pallas_call(
        partial(_decoder_kernel, tanh_in_bf16=tanh_in_bf16),
        out_shape=jax.ShapeDtypeStruct((B, Fp), jnp.float32),
        grid_spec=pltpu.PrefetchScalarGridSpec(
            num_scalar_prefetch=0,
            grid=grid,
            in_specs=[
                pl.BlockSpec((tb, E), lambda i: (i, 0)),    # x tile
                pl.BlockSpec((E, Hp), lambda i: (0, 0)),    # W1^T (resident)
                pl.BlockSpec((1, Hp), lambda i: (0, 0)),    # b1
                pl.BlockSpec((Hp, Fp), lambda i: (0, 0)),   # W2^T (resident)
                pl.BlockSpec((1, Fp), lambda i: (0, 0)),    # b2
            ],
            out_specs=pl.BlockSpec((tb, Fp), lambda i: (i, 0)),
        ),
        compiler_params=pltpu.CompilerParams(
            dimension_semantics=("parallel",),
            vmem_limit_bytes=vmem_limit,
        ),
        cost_estimate=cost,
    )(x, w1p, b1p, w2p, b2p)

    # Slice off feature padding only (no batch padding was added).
    return out[:, :F].astype(orig_dtype)


# ----------------------------- test harness -------------------------------- #

def init_params(key, embedding_features, in_features, hidden=2000):
    # Deterministic synthetic init (mimics nn.Linear's uniform(-1/sqrt(fan_in), +...)).
    k1, k2, k3, k4 = jax.random.split(key, 4)
    lim1 = 1.0 / jnp.sqrt(embedding_features)
    lim2 = 1.0 / jnp.sqrt(hidden)
    w1 = jax.random.uniform(k1, (hidden, embedding_features), jnp.float32, -lim1, lim1)
    b1 = jax.random.uniform(k2, (hidden,), jnp.float32, -lim1, lim1)
    w2 = jax.random.uniform(k3, (in_features, hidden), jnp.float32, -lim2, lim2)
    b2 = jax.random.uniform(k4, (in_features,), jnp.float32, -lim2, lim2)
    # Pre-transpose for the kernel: (in, out).
    return w1.T, b1, w2.T, b2


if __name__ == "__main__":
    embedding_features = 32   # decoder input width
    in_features = 64          # reconstructed feature width
    batch = 6                 # deliberately NOT a multiple of 8 -> exercises ragged last block

    key = jax.random.PRNGKey(0)
    kx, kp = jax.random.split(key)
    x = jax.random.normal(kx, (batch, embedding_features), jnp.float32)
    w1_t, b1, w2_t, b2 = init_params(kp, embedding_features, in_features)

    # Reference (same math as the PyTorch forward).
    ref = jax.nn.sigmoid(jnp.tanh(x @ w1_t + b1) @ w2_t + b2)

    # Default fast path: bf16 MXU operands (+ bf16 tanh on v6e/v7x), f32 accumulation.
    params_fast = prepare_decoder_params(w1_t, b1, w2_t, b2, use_bf16_matmul=True)
    out_fast = decoder_forward(x, params_fast)
    out_fast = jax.block_until_ready(out_fast)
    assert out_fast.shape == (batch, in_features)
    assert jnp.allclose(out_fast, ref, atol=5e-2, rtol=5e-2)

    # Strict f32 path (1e-5 guarantee).
    params_f32 = prepare_decoder_params(w1_t, b1, w2_t, b2, use_bf16_matmul=False)
    out_f32 = decoder_forward(x, params_f32)
    out_f32 = jax.block_until_ready(out_f32)
    assert out_f32.shape == (batch, in_features)
    assert jnp.allclose(out_f32, ref, atol=1e-5, rtol=1e-5)

    print("KERNEL_OK")
</pallas_src>

<mosaic_0001>
module attributes {stable_mosaic.version = 11 : i64} {
  func.func @_decoder_kernel(%arg0: i32, %arg1: memref<8x32xbf16, #tpu.memory_space<vmem>>, %arg2: memref<32x2048xbf16, #tpu.memory_space<vmem>>, %arg3: memref<1x2048xf32, #tpu.memory_space<vmem>>, %arg4: memref<2048x128xbf16, #tpu.memory_space<vmem>>, %arg5: memref<1x128xf32, #tpu.memory_space<vmem>>, %arg6: memref<8x128xf32, #tpu.memory_space<vmem>>) attributes {dimension_semantics = [#tpu.dimension_semantics<parallel>], iteration_bounds = array<i64: 1>, scalar_prefetch = 0 : i64, scratch_operands = 0 : i64, tpu.core_type = #tpu.core_type<tc>, window_params = [{transform_indices = @transform_0, window_bounds = array<i64: 8, 32>}, {pipeline_mode = #tpu.pipeline_mode<synchronous>, transform_indices = @transform_1, window_bounds = array<i64: 32, 2048>}, {pipeline_mode = #tpu.pipeline_mode<synchronous>, transform_indices = @transform_2, window_bounds = array<i64: 1, 2048>}, {pipeline_mode = #tpu.pipeline_mode<synchronous>, transform_indices = @transform_3, window_bounds = array<i64: 2048, 128>}, {pipeline_mode = #tpu.pipeline_mode<synchronous>, transform_indices = @transform_4, window_bounds = array<i64: 1, 128>}, {transform_indices = @transform_5, window_bounds = array<i64: 8, 128>}]} {
    %c0 = arith.constant 0 : index
    %c0_0 = arith.constant 0 : index
    %0 = vector.load %arg1[%c0, %c0_0] : memref<8x32xbf16, #tpu.memory_space<vmem>>, vector<8x32xbf16>
    %c0_1 = arith.constant 0 : index
    %c0_2 = arith.constant 0 : index
    %1 = vector.load %arg2[%c0_1, %c0_2] : memref<32x2048xbf16, #tpu.memory_space<vmem>>, vector<32x2048xbf16>
    %cst = arith.constant dense<0.000000e+00> : vector<8x2048xf32>
    %2 = tpu.matmul %0, %1, %cst {dimension_numbers = #tpu.dot_dimension_numbers<[1], [0], [0], [1], [0, 0, 1, 1], [], []>} : vector<8x32xbf16>, vector<32x2048xbf16>, vector<8x2048xf32> -> vector<8x2048xf32>
    %c0_3 = arith.constant 0 : index
    %c0_4 = arith.constant 0 : index
    %3 = vector.load %arg3[%c0_3, %c0_4] : memref<1x2048xf32, #tpu.memory_space<vmem>>, vector<1x2048xf32>
    %4 = vector.broadcast %3 : vector<1x2048xf32> to vector<8x2048xf32>
    %5 = arith.addf %2, %4 : vector<8x2048xf32>
    %6 = arith.truncf %5 : vector<8x2048xf32> to vector<8x2048xbf16>
    %7 = math.tanh %6 : vector<8x2048xbf16>
    %c0_5 = arith.constant 0 : index
    %c0_6 = arith.constant 0 : index
    %8 = vector.load %arg4[%c0_5, %c0_6] : memref<2048x128xbf16, #tpu.memory_space<vmem>>, vector<2048x128xbf16>
    %cst_7 = arith.constant dense<0.000000e+00> : vector<8x128xf32>
    %9 = tpu.matmul %7, %8, %cst_7 {dimension_numbers = #tpu.dot_dimension_numbers<[1], [0], [0], [1], [0, 0, 1, 1], [], []>} : vector<8x2048xbf16>, vector<2048x128xbf16>, vector<8x128xf32> -> vector<8x128xf32>
    %c0_8 = arith.constant 0 : index
    %c0_9 = arith.constant 0 : index
    %10 = vector.load %arg5[%c0_8, %c0_9] : memref<1x128xf32, #tpu.memory_space<vmem>>, vector<1x128xf32>
    %11 = vector.broadcast %10 : vector<1x128xf32> to vector<8x128xf32>
    %12 = arith.addf %9, %11 : vector<8x128xf32>
    %13 = arith.negf %12 : vector<8x128xf32>
    %14 = math.exp %13 : vector<8x128xf32>
    %cst_10 = arith.constant 1.000000e+00 : f32
    %15 = vector.broadcast %cst_10 : f32 to vector<8x128xf32>
    %16 = arith.addf %15, %14 : vector<8x128xf32>
    %17 = arith.divf %15, %16 : vector<8x128xf32>
    %c0_11 = arith.constant 0 : index
    %c0_12 = arith.constant 0 : index
    %18 = vector.load %arg6[%c0_11, %c0_12] : memref<8x128xf32, #tpu.memory_space<vmem>>, vector<8x128xf32>
    tpu.vector_store %arg6[%c0_11, %c0_12], %17 {strides = array<i32>} : memref<8x128xf32, #tpu.memory_space<vmem>>, vector<8x128xf32>,
    return
  }
  func.func @transform_0(%arg0: i32) -> (i32, i32) {
    %c0_i32 = arith.constant 0 : i32
    %c0_i32_0 = arith.constant 0 : i32
    return %arg0, %c0_i32 : i32, i32
  }
  func.func @transform_1(%arg0: i32) -> (i32, i32) {
    %c0_i32 = arith.constant 0 : i32
    %c0_i32_0 = arith.constant 0 : i32
    %c0_i32_1 = arith.constant 0 : i32
    return %c0_i32, %c0_i32_0 : i32, i32
  }
  func.func @transform_2(%arg0: i32) -> (i32, i32) {
    %c0_i32 = arith.constant 0 : i32
    %c0_i32_0 = arith.constant 0 : i32
    %c0_i32_1 = arith.constant 0 : i32
    return %c0_i32, %c0_i32_0 : i32, i32
  }
  func.func @transform_3(%arg0: i32) -> (i32, i32) {
    %c0_i32 = arith.constant 0 : i32
    %c0_i32_0 = arith.constant 0 : i32
    %c0_i32_1 = arith.constant 0 : i32
    return %c0_i32, %c0_i32_0 : i32, i32
  }
  func.func @transform_4(%arg0: i32) -> (i32, i32) {
    %c0_i32 = arith.constant 0 : i32
    %c0_i32_0 = arith.constant 0 : i32
    %c0_i32_1 = arith.constant 0 : i32
    return %c0_i32, %c0_i32_0 : i32, i32
  }
  func.func @transform_5(%arg0: i32) -> (i32, i32) {
    %c0_i32 = arith.constant 0 : i32
    %c0_i32_0 = arith.constant 0 : i32
    return %arg0, %c0_i32 : i32, i32
  }
}

</mosaic_0001>

<bundles_post_ra>
// kernel: tpu_custom_call.1
= control target key start
LH: loop header
LB: loop body
LE: loop exit
PB: predicated region body
PF: predicated region fallthrough
CT: control target
= control target key end

     0   :  { %10 = vsyncpa [#allocation3], 0  ;;  %s2937_s0 = inlined_call_operand.hbm [shape: bf16[6,32], index: 0, kind: input, shape index: {}]   ;;  %s2938_s1 = inlined_call_operand.hbm [shape: bf16[32,2048], index: 1, kind: input, shape index: {}]   ;;  %s2939_s2 = inlined_call_operand.hbm [shape: f32[1,2048], index: 2, kind: input, shape index: {}]   ;;  %s2940_s3 = inlined_call_operand.hbm [shape: bf16[2048,128], index: 3, kind: input, shape index: {}]   ;;  %s2941_s4 = inlined_call_operand.vmem [shape: f32[1,128], index: 4, kind: input, shape index: {}]   ;;  %s2942_s5 = inlined_call_operand.hbm [shape: f32[6,128], index: 5, kind: output, shape index: {}]  }
   0x1   :  { %11 = vsyncpa [#allocation6], 0 }
   0x2   :  { %12 = vsyncpa [#allocation9], 0 }
   0x3   :  { %13 = vsyncpa [#allocation4], 0  ;;  %s2726_s18 = smov [#allocation5]   ;;  %s2608_s22 = scalar_lea.hbm %s2938_s1, 4096 }
   0x4   :  { %s29_s19 = sshll.u32 %s2726_s18, 4  ;;  %p2609_p0 = scmp.ne.s32.totalorder %s2938_s1, %s2608_s22  ;;  %s30_s19 = int_to_ptr.vmem [resolvable:$true] %s29_s19 }
   0x5   :  { %p2612_p1 = scmp.lt.u32.totalorder %s2608_s22, %s2938_s1 }
   0x7   :  { %p2614_p2 = pnand %p2612_p1, %p2609_p0 }
   0x9   :  { %2617 = shalt.err (!%p2614_p2)
}
   0xa   :  { %s2618_s27 = scalar_lea.vmem %s30_s19, 4096  ;;  %p2623_p4 = scmp.lt.s32.totalorder %s30_s19, %s30_s19 }
   0xb   :  { %p2619_p3 = scmp.ne.s32.totalorder %s30_s19, %s2618_s27  ;;  %p2624_p5 = scmp.lt.s32.totalorder %s2618_s27, %s2618_s27 }
   0xd   :  { %p2625_p6 = por %p2624_p5, %p2623_p4 }
   0xf   :  { %p2626_p7 = pnand %p2625_p6, %p2619_p3 }
  0x11   :  { %2629 = shalt.err (!%p2626_p7)
}
  0x12   :  { %s2727_s28 = smov 1024   ;;  %s2728_s29 = smov 64  }
  0x13   :  { %35 = dma.hbm_to_vmem [thread:$0]  %s2938_s1, 4096, %s30_s19, [#allocation6], %s2727_s28, %s2727_s28, %s2728_s29  }
  0x14   :  { %s2729_s7 = smov [#allocation2]   ;;  %s2730_s9 = smov [#allocation7]  }
  0x15   :  { %s20_s8 = sshll.u32 %s2729_s7, 4  ;;  %s42_s10 = sshll.u32 %s2730_s9, 4  ;;  %s21_s8 = int_to_ptr.vmem [resolvable:$true] %s20_s8  ;;  %s43_s10 = int_to_ptr.vmem [resolvable:$true] %s42_s10 }
  0x16   :  { %s2630_s13 = scalar_lea.hbm %s2937_s0, 64 }
  0x17   :  { %p2631_p8 = scmp.ne.s32.totalorder %s2937_s0, %s2630_s13  ;;  %p2634_p9 = scmp.lt.u32.totalorder %s2630_s13, %s2937_s0 }
  0x19   :  { %p2636_p10 = pnand %p2634_p9, %p2631_p8 }
  0x1b   :  { %2639 = shalt.err (!%p2636_p10)
}
  0x1c   :  { %s2640_s1 = scalar_lea.vmem %s21_s8, 64  ;;  %p2645_p12 = scmp.lt.s32.totalorder %s21_s8, %s21_s8 }
  0x1d   :  { %p2641_p11 = scmp.ne.s32.totalorder %s21_s8, %s2640_s1  ;;  %p2646_p13 = scmp.lt.s32.totalorder %s2640_s1, %s2640_s1 }
  0x1f   :  { %p2647_p0 = por %p2646_p13, %p2645_p12 }
  0x21   :  { %p2648_p1 = pnand %p2647_p0, %p2641_p11 }
  0x23   :  { %2651 = shalt.err (!%p2648_p1)
}
  0x24   :  { %23 = dma.hbm_to_vmem [thread:$0]  %s2937_s0, 64, %s21_s8, [#allocation3]  }
  0x25   :  { %s2652_s22 = scalar_lea.hbm %s2939_s2, 256 }
  0x26   :  { %p2653_p2 = scmp.ne.s32.totalorder %s2939_s2, %s2652_s22  ;;  %p2656_p3 = scmp.lt.u32.totalorder %s2652_s22, %s2939_s2 }
  0x28   :  { %p2658_p4 = pnand %p2656_p3, %p2653_p2 }
  0x2a   :  { %2661 = shalt.err (!%p2658_p4)
}
  0x2b   :  { %s2662_s27 = scalar_lea.vmem %s43_s10, 256  ;;  %p2667_p6 = scmp.lt.s32.totalorder %s43_s10, %s43_s10 }
  0x2c   :  { %p2663_p5 = scmp.ne.s32.totalorder %s43_s10, %s2662_s27  ;;  %p2668_p7 = scmp.lt.s32.totalorder %s2662_s27, %s2662_s27 }
  0x2e   :  { %p2669_p8 = por %p2668_p7, %p2667_p6 }
  0x30   :  { %p2670_p9 = pnand %p2669_p8, %p2663_p5 }
  0x32   :  { %2673 = shalt.err (!%p2670_p9)
}
  0x33   :  { %45 = dma.hbm_to_vmem [thread:$0]  %s2939_s2, 256, %s43_s10, [#allocation6]  }
  0x34   :  { %s2731_s30 = smov [#allocation8]   ;;  %s2674_s9 = scalar_lea.hbm %s2940_s3, 16384 }
  0x35   :  { %s51_s6 = sshll.u32 %s2731_s30, 4  ;;  %p2675_p10 = scmp.ne.s32.totalorder %s2940_s3, %s2674_s9  ;;  %s52_s6 = int_to_ptr.vmem [resolvable:$true] %s51_s6 }
  0x36   :  { %p2678_p11 = scmp.lt.u32.totalorder %s2674_s9, %s2940_s3 }
  0x38   :  { %p2680_p12 = pnand %p2678_p11, %p2675_p10 }
  0x3a   :  { %2683 = shalt.err (!%p2680_p12)
}
  0x3b   :  { %s2684_s15 = scalar_lea.vmem %s52_s6, 16384  ;;  %p2689_p0 = scmp.lt.s32.totalorder %s52_s6, %s52_s6 }
  0x3c   :  { %p2685_p13 = scmp.ne.s32.totalorder %s52_s6, %s2684_s15  ;;  %p2690_p1 = scmp.lt.s32.totalorder %s2684_s15, %s2684_s15 }
  0x3e   :  { %p2691_p2 = por %p2690_p1, %p2689_p0 }
  0x40   :  { %p2692_p3 = pnand %p2691_p2, %p2685_p13 }
  0x42   :  { %2695 = shalt.err (!%p2692_p3)
}
  0x43   :  { %s2732_s2 = smov 4  }
  0x44   :  { %57 = dma.hbm_to_vmem [thread:$0]  %s2940_s3, 16384, %s52_s6, [#allocation9], %s2728_s29, %s2728_s29, %s2732_s2  }
  0x45   :  { %2718 = dma.done.wait [#allocation3], 64  }
  0x46   :  { %2719 = vsyncadd [#allocation3], 4294967232 }
  0x47   :  { %2720 = dma.done.wait [#allocation6], 4352  }
  0x48   :  { %2721 = vsyncadd [#allocation6], 4294962944 }
  0x49   :  { %2722 = dma.done.wait [#allocation9], 16384  }
  0x4a   :  { %2723 = vsyncadd [#allocation9], 4294950912  ;;  %v2733_v0 = vmov 0   ;;  %v74_v1 = vld [vmem:[#allocation5] sm:$0xff]  ;;  %v75_v3 = vld [vmem:[#allocation5 + $0x8] sm:$0xff]  ;;  %vm350_vm0 = vcmask 261120  }
  0x4b   :  { %386 = vmatprep.mubr.bf16.mxu0 %v2733_v0  ;;  %427 = vmatprep.mubr.bf16.mxu1 %v2733_v0  ;;  %v82_v2 = vld [vmem:[#allocation5 + $0x40] sm:$0xff]  ;;  %v83_v5 = vld [vmem:[#allocation5 + $0x48] sm:$0xff]  ;;  %v76_v15 = vld [vmem:[#allocation5 + $0x10] sm:$0xff] }
  0x4c   :  { %v2090_v4 = vcombine.high %v74_v1, %v82_v2  ;;  %v2089_v6 = vcombine.low %v74_v1, %v82_v2  ;;  %v90_v7 = vld [vmem:[#allocation5 + $0x80] sm:$0xff]  ;;  %v2092_v9 = vcombine.high %v75_v3, %v83_v5  ;;  %v2091_v10 = vcombine.low %v75_v3, %v83_v5  ;;  %v91_v12 = vld [vmem:[#allocation5 + $0x88] sm:$0xff]  ;;  %v84_v16 = vld [vmem:[#allocation5 + $0x50] sm:$0xff] }
  0x4d   :  { %v98_v8 = vld [vmem:[#allocation5 + $0xc0] sm:$0xff]  ;;  %v99_v13 = vld [vmem:[#allocation5 + $0xc8] sm:$0xff]  ;;  %v77_v17 = vld [vmem:[#allocation5 + $0x18] sm:$0xff]  ;;  %v2094_v21 = vcombine.high %v76_v15, %v84_v16  ;;  %v2093_v28 = vcombine.low %v76_v15, %v84_v16 }
  0x4e   :  { %v2106_v11 = vcombine.high %v90_v7, %v98_v8  ;;  %354 = vmatprep.subr.bf16.mxu0 %v2090_v4  ;;  %v2108_v14 = vcombine.high %v91_v12, %v99_v13  ;;  %395 = vmatprep.subr.bf16.mxu1 %v2092_v9  ;;  %v2105_v18 = vcombine.low %v90_v7, %v98_v8  ;;  %v85_v19 = vld [vmem:[#allocation5 + $0x58] sm:$0xff]  ;;  %v92_v23 = vld [vmem:[#allocation5 + $0x90] sm:$0xff]  ;;  %v78_v32 = vld [vmem:[#allocation5 + $0x20] sm:$0xff] }
  0x4f   :  { %355 = vmatpush1.bf16.msra.mxu0 %v2089_v6  ;;  %396 = vmatpush1.bf16.msra.mxu1 %v2091_v10  ;;  %v2107_v20 = vcombine.low %v91_v12, %v99_v13  ;;  %v2096_v22 = vcombine.high %v77_v17, %v85_v19  ;;  %v100_v24 = vld [vmem:[#allocation5 + $0xd0] sm:$0xff]  ;;  %v93_v25 = vld [vmem:[#allocation5 + $0x98] sm:$0xff]  ;;  %v2095_v29 = vcombine.low %v77_v17, %v85_v19  ;;  %v86_v33 = vld [vmem:[#allocation5 + $0x60] sm:$0xff] }
  0x50   :  { %356 = vmatprep.subr.bf16.mxu0 %v2106_v11  ;;  %397 = vmatprep.subr.bf16.mxu1 %v2108_v14  ;;  %v101_v26 = vld [vmem:[#allocation5 + $0xd8] sm:$0xff]  ;;  %v2110_v30 = vcombine.high %v92_v23, %v100_v24  ;;  %v79_v34 = vld [vmem:[#allocation5 + $0x28] sm:$0xff]  ;;  %v2109_v36 = vcombine.low %v92_v23, %v100_v24  ;;  %v94_v37 = vld [vmem:[#allocation5 + $0xa0] sm:$0xff]  ;;  %v2098_v39 = vcombine.high %v78_v32, %v86_v33 }
  0x51   :  { %v2818_v27 = vld [vmem:[#allocation2] sm:$0xf]  ;;  %v2112_v31 = vcombine.high %v93_v25, %v101_v26  ;;  %v87_v35 = vld [vmem:[#allocation5 + $0x68] sm:$0xff]  ;;  %v2111_v38 = vcombine.low %v93_v25, %v101_v26  ;;  %v102_v40 = vld [vmem:[#allocation5 + $0xe0] sm:$0xff]  ;;  %v2097_v44 = vcombine.low %v78_v32, %v86_v33 }
  0x52   :  { %v2100_v41 = vcombine.high %v79_v34, %v87_v35  ;;  %v95_v42 = vld [vmem:[#allocation5 + $0xa8] sm:$0xff]  ;;  %v80_v45 = vld [vmem:[#allocation5 + $0x30] sm:$0xff]  ;;  %v2099_v46 = vcombine.low %v79_v34, %v87_v35  ;;  %v2114_v47 = vcombine.high %v94_v37, %v102_v40  ;;  %v81_v50 = vld [vmem:[#allocation5 + $0x38] sm:$0xff]  ;;  %v2113_v52 = vcombine.low %v94_v37, %v102_v40 }
  0x53   :  { %357 = vmatpush1.bf16.msra.mxu0 %v2105_v18  ;;  %398 = vmatpush1.bf16.msra.mxu1 %v2107_v20  ;;  %v103_v43 = vld [vmem:[#allocation5 + $0xe8] sm:$0xff]  ;;  %v88_v48 = vld [vmem:[#allocation5 + $0x70] sm:$0xff]  ;;  %v89_v51 = vld [vmem:[#allocation5 + $0x78] sm:$0xff] }
  0x54   :  { %436 = vmatprep.subr.bf16.mxu0 %v2094_v21  ;;  %477 = vmatprep.subr.bf16.mxu1 %v2096_v22  ;;  %v2116_v49 = vcombine.high %v95_v42, %v103_v43  ;;  %v96_v53 = vld [vmem:[#allocation5 + $0xb0] sm:$0xff]  ;;  %v2115_v54 = vcombine.low %v95_v42, %v103_v43  ;;  %v2102_v55 = vcombine.high %v80_v45, %v88_v48  ;;  %v97_v58 = vld [vmem:[#allocation5 + $0xb8] sm:$0xff]  ;;  %v2452_v11 = vld [vmem:[#allocation8 + $0x50] sm:$0xff]  }
  0x55   :  { %v104_v56 = vld [vmem:[#allocation5 + $0xf0] sm:$0xff]  ;;  %v2104_v57 = vcombine.high %v81_v50, %v89_v51  ;;  %v105_v59 = vld [vmem:[#allocation5 + $0xf8] sm:$0xff]  ;;  %v2101_v60 = vcombine.low %v80_v45, %v88_v48  ;;  %v2103_v61 = vcombine.low %v81_v50, %v89_v51  ;;  %v2453_v12 = vld [vmem:[#allocation8 + $0xd0] sm:$0xff]  }
  0x56   :  { %2121 = vmatmul.mubr.msk.bf16.vlgmr.msra.gmra.mrb[0].mxu0 %vm350_vm0, %v2818_v27  ;;  %2122 = vmatmul.mubr.msk.bf16.vlgmr.msra.gmra.mrb[0].mxu1 %vm350_vm0, %v2818_v27  ;;  %v2118_v62 = vcombine.high %v96_v53, %v104_v56  ;;  %v2120_v63 = vcombine.high %v97_v58, %v105_v59  ;;  %v2444_v1 = vld [vmem:[#allocation8 + $0x40] sm:$0xff]   ;;  %v2117_v2 = vcombine.low %v96_v53, %v104_v56  ;;  %v2448_v7 = vld [vmem:[#allocation8 + $0x48] sm:$0xff]   ;;  %v2455_v13 = vld [vmem:[#allocation8 + $0x90] sm:$0xff]  }
  0x57   :  { %437 = vmatpush1.bf16.msra.mxu0 %v2093_v28  ;;  %478 = vmatpush1.bf16.msra.mxu1 %v2095_v29  ;;  %v2445_v3 = vld [vmem:[#allocation8 + $0xc0] sm:$0xff]   ;;  %v2119_v4 = vcombine.low %v97_v58, %v105_v59  ;;  %v2449_v8 = vld [vmem:[#allocation8 + $0xc8] sm:$0xff]   ;;  %v2456_v14 = vld [vmem:[#allocation8 + $0x58] sm:$0xff]  }
  0x58   :  { %438 = vmatprep.subr.bf16.mxu0 %v2110_v30  ;;  %479 = vmatprep.subr.bf16.mxu1 %v2112_v31  ;;  %v2446_v5 = vld [vmem:[#allocation8] sm:$0xff]   ;;  %v2450_v9 = vld [vmem:[#allocation8 + $0x8] sm:$0xff]   ;;  %v2457_v15 = vld [vmem:[#allocation8 + $0xd8] sm:$0xff]  }
  0x59   :  { %468 = vmatprep.mubr.bf16.mxu0 %v2733_v0  ;;  %509 = vmatprep.mubr.bf16.mxu1 %v2733_v0  ;;  %v2447_v6 = vld [vmem:[#allocation8 + $0x80] sm:$0xff]   ;;  %v2451_v10 = vld [vmem:[#allocation8 + $0x88] sm:$0xff]   ;;  %v2458_v16 = vld [vmem:[#allocation8 + $0x18] sm:$0xff]  }
  0x5a   :  { %v2459_v17 = vld [vmem:[#allocation8 + $0x98] sm:$0xff]   ;;  %v2460_v18 = vld [vmem:[#allocation8 + $0x60] sm:$0xff]   ;;  %v2464_v22 = vld [vmem:[#allocation8 + $0x68] sm:$0xff]  }
  0x5b   :  { %439 = vmatpush1.bf16.msra.mxu0 %v2109_v36  ;;  %480 = vmatpush1.bf16.msra.mxu1 %v2111_v38  ;;  %v2461_v19 = vld [vmem:[#allocation8 + $0xe0] sm:$0xff]   ;;  %v2465_v23 = vld [vmem:[#allocation8 + $0xe8] sm:$0xff]   ;;  %v2468_v26 = vld [vmem:[#allocation8 + $0x70] sm:$0xff]   ;;  %v110_v36 = vlaneseq }
  0x5c   :  { %518 = vmatprep.subr.bf16.mxu0 %v2098_v39  ;;  %559 = vmatprep.subr.bf16.mxu1 %v2100_v41  ;;  %v2462_v20 = vld [vmem:[#allocation8 + $0x20] sm:$0xff]   ;;  %v2466_v24 = vld [vmem:[#allocation8 + $0x28] sm:$0xff]   ;;  %v2470_v28 = vld [vmem:[#allocation8 + $0x30] sm:$0xff]  }
  0x5d   :  { %v2463_v21 = vld [vmem:[#allocation8 + $0xa0] sm:$0xff]   ;;  %v2467_v25 = vld [vmem:[#allocation8 + $0xa8] sm:$0xff]   ;;  %v2471_v29 = vld [vmem:[#allocation8 + $0xb0] sm:$0xff]   ;;  %v2842_v37 = vshrl.u32 %v110_v36, 7 }
  0x5e   :  { %2123 = vmatmul.mubr.msk.bf16.vlgmr.msra.gmra.mrb[4].mxu0 %vm350_vm0, %v2818_v27  ;;  %2124 = vmatmul.mubr.msk.bf16.vlgmr.msra.gmra.mrb[4].mxu1 %vm350_vm0, %v2818_v27  ;;  %v2472_v30 = vld [vmem:[#allocation8 + $0x78] sm:$0xff]   ;;  %v2476_v34 = vld [vmem:[#allocation8 + $0x140] sm:$0xff]   ;;  %v2845_v39 = vld [vmem:[#allocation7] sm:$0xff] }
  0x5f   :  { %519 = vmatpush1.bf16.msra.mxu0 %v2097_v44  ;;  %560 = vmatpush1.bf16.msra.mxu1 %v2099_v46  ;;  %v2473_v31 = vld [vmem:[#allocation8 + $0xf8] sm:$0xff]   ;;  %v2477_v35 = vld [vmem:[#allocation8 + $0x1c0] sm:$0xff]   ;;  %v112_v38 = vsub.s32 0, %v2842_v37  ;;  %v120_v40 = vsub.s32 2, %v2842_v37  ;;  %v116_v41 = vsub.s32 1, %v2842_v37  ;;  %v124_v42 = vsub.s32 3, %v2842_v37 }
  0x60   :  { %520 = vmatprep.subr.bf16.mxu0 %v2114_v47  ;;  %561 = vmatprep.subr.bf16.mxu1 %v2116_v49  ;;  %v2474_v32 = vld [vmem:[#allocation8 + $0x38] sm:$0xff]   ;;  %v136_v36 = vsub.s32 6, %v2842_v37 }
  0x61   :  { %550 = vmatprep.mubr.bf16.mxu0 %v2733_v0  ;;  %591 = vmatprep.mubr.bf16.mxu1 %v2733_v0  ;;  %v2475_v33 = vld [vmem:[#allocation8 + $0xb8] sm:$0xff]   ;;  %v113_v43 = vrot.slane %v2845_v39, %v112_v38  ;;  %v121_v44 = vrot.slane %v2845_v39, %v120_v40  ;;  %v117_v45 = vrot.slane %v2845_v39, %v116_v41 }
  0x62   :  { %v125_v46 = vrot.slane %v2845_v39, %v124_v42 }
  0x63   :  { %521 = vmatpush1.bf16.msra.mxu0 %v2113_v52  ;;  %562 = vmatpush1.bf16.msra.mxu1 %v2115_v54 }
  0x64   :  { %600 = vmatprep.subr.bf16.mxu0 %v2102_v55  ;;  %641 = vmatprep.subr.bf16.mxu1 %v2104_v57  ;;  %v132_v55 = vsub.s32 5, %v2842_v37 }
  0x66   :  { %2125 = vmatmul.mubr.msk.bf16.vlgmr.msra.gmra.mrb[8].mxu0 %vm350_vm0, %v2818_v27  ;;  %2126 = vmatmul.mubr.msk.bf16.vlgmr.msra.gmra.mrb[8].mxu1 %vm350_vm0, %v2818_v27 }
  0x67   :  { %601 = vmatpush1.bf16.msra.mxu0 %v2101_v60  ;;  %642 = vmatpush1.bf16.msra.mxu1 %v2103_v61  ;;  %v140_v60 = vsub.s32 7, %v2842_v37 }
  0x68   :  { %602 = vmatprep.subr.bf16.mxu0 %v2118_v62  ;;  %643 = vmatprep.subr.bf16.mxu1 %v2120_v63 }
  0x69   :  { %632 = vmatprep.mubr.bf16.mxu0 %v2733_v0  ;;  %673 = vmatprep.mubr.bf16.mxu1 %v2733_v0  ;;  %v2454_v0 = vld [vmem:[#allocation8 + $0x10] sm:$0xff]  }
  0x6b   :  { %603 = vmatpush1.bf16.msra.mxu0 %v2117_v2  ;;  %644 = vmatpush1.bf16.msra.mxu1 %v2119_v4  ;;  %v133_v2 = vrot.slane %v2845_v39, %v132_v55 }
  0x6c   :  { %2259 = vmatprep.subr.bf16.mxu0 %v2444_v1  ;;  %2281 = vmatprep.subr.bf16.mxu1 %v2445_v3  ;;  %v141_v3 = vrot.slane %v2845_v39, %v140_v60 }
  0x6e   :  { %2127 = vmatmul.mubr.msk.bf16.vlgmr.msra.gmra.mrb[12].mxu0 %vm350_vm0, %v2818_v27  ;;  %2128 = vmatmul.mubr.msk.bf16.vlgmr.msra.gmra.mrb[12].mxu1 %vm350_vm0, %v2818_v27  ;;  %v2469_v27 = vld [vmem:[#allocation8 + $0xf0] sm:$0xff]  }
  0x6f   :  { %2260 = vmatpush3.bf16.msra.mxu0 %v2446_v5  ;;  %2282 = vmatpush3.bf16.msra.mxu1 %v2447_v6 }
  0x70   :  { %2261 = vmatprep.subr.bf16.mxu0 %v2448_v7  ;;  %2283 = vmatprep.subr.bf16.mxu1 %v2449_v8 }
  0x73   :  { %2262 = vmatpush3.bf16.msra.mxu0 %v2450_v9  ;;  %2284 = vmatpush3.bf16.msra.mxu1 %v2451_v10  ;;  %v2870_v10 = vld [vmem:[#allocation7 + $0x8] sm:$0xff] }
  0x74   :  { %2263 = vmatprep.subr.bf16.mxu0 %v2452_v11  ;;  %2285 = vmatprep.subr.bf16.mxu1 %v2453_v12 }
  0x77   :  { %2264 = vmatpush3.bf16.msra.mxu0 %v2454_v0  ;;  %2286 = vmatpush3.bf16.msra.mxu1 %v2455_v13 }
  0x78   :  { %2265 = vmatprep.subr.bf16.mxu0 %v2456_v14  ;;  %2287 = vmatprep.subr.bf16.mxu1 %v2457_v15 }
  0x7b   :  { %2266 = vmatpush3.bf16.msra.mxu0 %v2458_v16  ;;  %2288 = vmatpush3.bf16.msra.mxu1 %v2459_v17  ;;  %v145_v16 = vrot.slane %v2870_v10, %v112_v38  ;;  %v153_v17 = vrot.slane %v2870_v10, %v120_v40  ;;  %v2482_v40 = vld [vmem:[#allocation8 + $0x108] sm:$0xff]  }
  0x7c   :  { %2267 = vmatprep.subr.bf16.mxu0 %v2460_v18  ;;  %2289 = vmatprep.subr.bf16.mxu1 %v2461_v19 }
  0x7f   :  { %2268 = vmatpush3.bf16.msra.mxu0 %v2462_v20  ;;  %2290 = vmatpush3.bf16.msra.mxu1 %v2463_v21  ;;  %v2478_v21 = vld [vmem:[#allocation8 + $0x100] sm:$0xff]  }
  0x80   :  { %2269 = vmatprep.subr.bf16.mxu0 %v2464_v22  ;;  %2291 = vmatprep.subr.bf16.mxu1 %v2465_v23 }
  0x83   :  { %2270 = vmatpush3.bf16.msra.mxu0 %v2466_v24  ;;  %2292 = vmatpush3.bf16.msra.mxu1 %v2467_v25 }
  0x84   :  { %2271 = vmatprep.subr.bf16.mxu0 %v2468_v26  ;;  %2293 = vmatprep.subr.bf16.mxu1 %v2469_v27  ;;  %v2479_v26 = vld [vmem:[#allocation8 + $0x180] sm:$0xff]   ;;  %v2480_v27 = vld [vmem:[#allocation8 + $0x148] sm:$0xff]  }
  0x87   :  { %2272 = vmatpush3.bf16.msra.mxu0 %v2470_v28  ;;  %2294 = vmatpush3.bf16.msra.mxu1 %v2471_v29 }
  0x88   :  { %2273 = vmatprep.subr.bf16.mxu0 %v2472_v30  ;;  %2295 = vmatprep.subr.bf16.mxu1 %v2473_v31 }
  0x8b   :  { %2274 = vmatpush3.bf16.msra.mxu0 %v2474_v32  ;;  %2296 = vmatpush3.bf16.msra.mxu1 %v2475_v33  ;;  %v2481_v32 = vld [vmem:[#allocation8 + $0x1c8] sm:$0xff]   ;;  %v128_v33 = vsub.s32 4, %v2842_v37 }
  0x8c   :  { %2303 = vmatprep.subr.bf16.mxu0 %v2476_v34  ;;  %2325 = vmatprep.subr.bf16.mxu1 %v2477_v35 }
 0x129   :  { %v388_v47 = vpop.f32.mrb[0].mxu0  ;;  %v429_v49 = vpop.f32.mrb[0].mxu1 }
 0x12a   :  { %v389_v48 = vadd.f32 %v388_v47, %v113_v43  ;;  %v390_v50 = vpop.f32.mrb[1].mxu0  ;;  %v430_v51 = vadd.f32 %v429_v49, %v121_v44  ;;  %v431_v53 = vpop.f32.mrb[1].mxu1  ;;  %v161_v43 = vrot.slane %v2870_v10, %v128_v33  ;;  %v2483_v44 = vld [vmem:[#allocation8 + $0x188] sm:$0xff]   ;;  %v2485_v47 = vld [vmem:[#allocation8 + $0x1d0] sm:$0xff]  }
 0x12b   :  { %v391_v52 = vadd.f32 %v390_v50, %v117_v45  ;;  %v392_v54 = vpop.f32.mrb[2].mxu0  ;;  %v432_v57 = vadd.f32 %v431_v53, %v125_v46  ;;  %v433_v58 = vpop.f32.mrb[2].mxu1  ;;  %v2484_v45 = vld [vmem:[#allocation8 + $0x150] sm:$0xff]   ;;  %v169_v46 = vrot.slane %v2870_v10, %v136_v36 }
 0x12c   :  { %v682_v56 = vpack.c.bf16 %v389_v48, %v389_v48  ;;  %v393_v59 = vpop.f32.mrb[3].mxu0  ;;  %v684_v61 = vpack.c.bf16 %v430_v51, %v430_v51  ;;  %v434_v63 = vpop.f32.mrb[3].mxu1  ;;  %v2486_v50 = vld [vmem:[#allocation8 + $0x110] sm:$0xff]  }
 0x12d   :  { %v683_v62 = vpack.c.bf16 %v391_v52, %v391_v52  ;;  %v685_v1 = vpack.c.bf16 %v432_v57, %v432_v57  ;;  %v2487_v54 = vld [vmem:[#allocation8 + $0x190] sm:$0xff]   ;;  %v2488_v57 = vld [vmem:[#allocation8 + $0x158] sm:$0xff]  }
 0x12e   :  { %2572 = vtanh.bf16 %v682_v56  ;;  %v129_v56 = vrot.slane %v2845_v39, %v128_v33  ;;  %v2489_v63 = vld [vmem:[#allocation8 + $0x1d8] sm:$0xff]   ;;  %v2509_v33 = vld [vmem:[#allocation8 + $0x2c0] sm:$0xff]  }
 0x12f   :  { %2574 = vtanh.bf16 %v684_v61 }
 0x130   :  { %2576 = vtanh.bf16 %v683_v62 }
 0x131   :  { %2578 = vtanh.bf16 %v685_v1  ;;  %v2866_v4 = vpop.f32.mrb[4].mxu0  ;;  %v2868_v6 = vpop.f32.mrb[4].mxu1  ;;  %v137_v1 = vrot.slane %v2845_v39, %v136_v36  ;;  %v157_v39 = vrot.slane %v2870_v10, %v124_v42  ;;  %v2498_v42 = vld [vmem:[#allocation8 + $0x128] sm:$0xff]  }
 0x132   :  { %v472_v5 = vpop.f32.mrb[5].mxu0  ;;  %v513_v9 = vpop.f32.mrb[5].mxu1 }
 0x133   :  { %v473_v7 = vadd.f32 %v472_v5, %v133_v2  ;;  %v474_v8 = vpop.f32.mrb[6].mxu0  ;;  %v514_v12 = vadd.f32 %v513_v9, %v141_v3  ;;  %v515_v0 = vpop.f32.mrb[6].mxu1  ;;  %v471_v9 = vadd.f32 %v2866_v4, %v129_v56  ;;  %v2496_v4 = vld [vmem:[#allocation8 + $0x168] sm:$0xff]   ;;  %v2521_v56 = vld [vmem:[#allocation8 + $0x2d8] sm:$0xff]  }
 0x134   :  { %v475_v11 = vpop.f32.mrb[7].mxu0  ;;  %v516_v14 = vpop.f32.mrb[7].mxu1  ;;  %v149_v8 = vrot.slane %v2870_v10, %v116_v41  ;;  %v512_v0 = vadd.f32 %v2868_v6, %v137_v1  ;;  %v2495_v41 = vld [vmem:[#allocation8 + $0x1a0] sm:$0xff]   ;;  %v2499_v6 = vld [vmem:[#allocation8 + $0x1a8] sm:$0xff]   ;;  %v173_v1 = vrot.slane %v2870_v10, %v140_v60 }
 0x135   :  { %v687_v13 = vpack.c.bf16 %v473_v7, %v473_v7  ;;  %v689_v15 = vpack.c.bf16 %v514_v12, %v514_v12  ;;  %v2490_v7 = vld [vmem:[#allocation8 + $0x118] sm:$0xff]   ;;  %v2492_v12 = vld [vmem:[#allocation8 + $0x160] sm:$0xff]   ;;  %v2529_v60 = vld [vmem:[#allocation8 + $0x2e8] sm:$0xff]  }
 0x136   :  { %v2491_v11 = vld [vmem:[#allocation8 + $0x198] sm:$0xff]   ;;  %v2494_v14 = vld [vmem:[#allocation8 + $0x120] sm:$0xff]  }
 0x137   :  { %2580 = vtanh.bf16 %v687_v13  ;;  %v2493_v13 = vld [vmem:[#allocation8 + $0x1e0] sm:$0xff]  }
 0x138   :  { %2582 = vtanh.bf16 %v689_v15 }
 0x139   :  { %v2573_v18 = vpop.eup %2572  ;;  %v552_v19 = vpop.f32.mrb[8].mxu0 }
 0x13a   :  { %v2575_v20 = vpop.eup %2574  ;;  %v2874_v22 = vadd.f32 %v552_v19, %v145_v16  ;;  %v2876_v23 = vpop.f32.mrb[9].mxu0  ;;  %v686_v16 = vpack.c.bf16 %v471_v9, %v471_v9  ;;  %v2497_v19 = vld [vmem:[#allocation8 + $0x1e8] sm:$0xff]  }
 0x13b   :  { %v593_v24 = vpop.f32.mrb[8].mxu1  ;;  %v2577_v25 = vpop.eup %2576  ;;  %v555_v15 = vadd.f32 %v2876_v23, %v149_v8  ;;  %v2501_v23 = vld [vmem:[#allocation8 + $0x1f0] sm:$0xff]   ;;  %v2528_v8 = vld [vmem:[#allocation8 + $0x268] sm:$0xff]  }
 0x13c   :  { %v556_v28 = vpop.f32.mrb[10].mxu0  ;;  %v2878_v29 = vadd.f32 %v593_v24, %v153_v17  ;;  %v2880_v30 = vpop.f32.mrb[9].mxu1  ;;  %1777 = vmatprep.mubr.bf16.mxu0 %v2577_v25  ;;  %2584 = vtanh.bf16 %v686_v16  ;;  %v2502_v25 = vld [vmem:[#allocation8 + $0x130] sm:$0xff]   ;;  %v2540_v16 = vld [vmem:[#allocation8 + $0x340] sm:$0xff]  }
 0x13d   :  { %v2579_v31 = vpop.eup %2578  ;;  %v557_v34 = vpop.f32.mrb[11].mxu0  ;;  %1778 = vmatmul.mubr.bf16.vlgmr.msra.gmra.mrb[16].mxu0 %v2573_v18  ;;  %v596_v17 = vadd.f32 %v2880_v30, %v157_v39  ;;  %v688_v18 = vpack.c.bf16 %v512_v0, %v512_v0  ;;  %v2505_v28 = vld [vmem:[#allocation8 + $0x1f8] sm:$0xff]   ;;  %v2533_v39 = vld [vmem:[#allocation8 + $0x2f0] sm:$0xff]  }
 0x13e   :  { %v597_v35 = vpop.f32.mrb[10].mxu1  ;;  %1817 = vmatprep.mubr.bf16.mxu1 %v2579_v31  ;;  %2304 = vmatpush3.bf16.msra.mxu0 %v2478_v21  ;;  %v2500_v21 = vld [vmem:[#allocation8 + $0x170] sm:$0xff]   ;;  %v2506_v30 = vld [vmem:[#allocation8 + $0x138] sm:$0xff]   ;;  %v692_v37 = vpack.c.bf16 %v2878_v29, %v2878_v29 }
 0x13f   :  { %v598_v38 = vpop.f32.mrb[11].mxu1  ;;  %1818 = vmatmul.mubr.bf16.vlgmr.msra.gmra.mrb[16].mxu1 %v2575_v20  ;;  %2305 = vmatprep.subr.bf16.mxu0 %v2480_v27  ;;  %v691_v20 = vpack.c.bf16 %v555_v15, %v555_v15  ;;  %v693_v24 = vpack.c.bf16 %v596_v17, %v596_v17  ;;  %2586 = vtanh.bf16 %v688_v18  ;;  %v2504_v27 = vld [vmem:[#allocation8 + $0x178] sm:$0xff]   ;;  %v2510_v35 = vld [vmem:[#allocation8 + $0x200] sm:$0xff]   ;;  %v2534_v0 = vld [vmem:[#allocation8 + $0x230] sm:$0xff]  }
 0x140   :  { %2326 = vmatpush3.bf16.msra.mxu1 %v2479_v26  ;;  %v2503_v26 = vld [vmem:[#allocation8 + $0x1b0] sm:$0xff]   ;;  %v2507_v31 = vld [vmem:[#allocation8 + $0x1b8] sm:$0xff]   ;;  %v2511_v38 = vld [vmem:[#allocation8 + $0x280] sm:$0xff]  }
 0x141   :  { %2327 = vmatprep.subr.bf16.mxu1 %v2481_v32  ;;  %v634_v48 = vpop.f32.mrb[12].mxu0  ;;  %v675_v53 = vpop.f32.mrb[12].mxu1  ;;  %2588 = vtanh.bf16 %v691_v20  ;;  %v2508_v32 = vld [vmem:[#allocation8 + $0x240] sm:$0xff]   ;;  %v2535_v29 = vld [vmem:[#allocation8 + $0x2b0] sm:$0xff]   ;;  %v2539_v15 = vld [vmem:[#allocation8 + $0x2b8] sm:$0xff]  }
 0x142   :  { %v2581_v49 = vpop.eup %2580  ;;  %2306 = vmatpush3.bf16.msra.mxu0 %v2482_v40  ;;  %v2886_v51 = vadd.f32 %v634_v48, %v161_v43  ;;  %v2888_v52 = vpop.f32.mrb[13].mxu0  ;;  %v2891_v59 = vadd.f32 %v675_v53, %v169_v46  ;;  %2590 = vtanh.bf16 %v693_v24  ;;  %v2512_v40 = vld [vmem:[#allocation8 + $0x248] sm:$0xff]   ;;  %v2516_v48 = vld [vmem:[#allocation8 + $0x250] sm:$0xff]   ;;  %v2542_v17 = vld [vmem:[#allocation8 + $0x300] sm:$0xff]  }
 0x143   :  { %2307 = vmatprep.subr.bf16.mxu0 %v2484_v45  ;;  %v638_v58 = vpop.f32.mrb[14].mxu0  ;;  %v2893_v61 = vpop.f32.mrb[13].mxu1  ;;  %1857 = vmatprep.mubr.bf16.mxu0 %v2581_v49  ;;  %v2513_v43 = vld [vmem:[#allocation8 + $0x2c8] sm:$0xff]   ;;  %v2517_v49 = vld [vmem:[#allocation8 + $0x2d0] sm:$0xff]  }
 0x144   :  { %2328 = vmatpush3.bf16.msra.mxu1 %v2483_v44  ;;  %v2583_v62 = vpop.eup %2582  ;;  %v639_v2 = vpop.f32.mrb[15].mxu0  ;;  %v2514_v46 = vld [vmem:[#allocation8 + $0x208] sm:$0xff]   ;;  %v2519_v53 = vld [vmem:[#allocation8 + $0x290] sm:$0xff]   ;;  %v165_v58 = vrot.slane %v2870_v10, %v132_v55  ;;  %v2527_v55 = vld [vmem:[#allocation8 + $0x2a0] sm:$0xff]   ;;  %v678_v9 = vadd.f32 %v2893_v61, %v173_v1 }
 0x145   :  { %2329 = vmatprep.subr.bf16.mxu1 %v2485_v47  ;;  %v679_v3 = vpop.f32.mrb[14].mxu1  ;;  %1897 = vmatprep.mubr.bf16.mxu1 %v2583_v62  ;;  %v2515_v47 = vld [vmem:[#allocation8 + $0x288] sm:$0xff]   ;;  %v2523_v62 = vld [vmem:[#allocation8 + $0x298] sm:$0xff]   ;;  %v2525_v2 = vld [vmem:[#allocation8 + $0x2e0] sm:$0xff]  }
 0x146   :  { %v680_v5 = vpop.f32.mrb[15].mxu1  ;;  %2308 = vmatpush3.bf16.msra.mxu0 %v2486_v50  ;;  %v2518_v50 = vld [vmem:[#allocation8 + $0x210] sm:$0xff]   ;;  %v2526_v3 = vld [vmem:[#allocation8 + $0x220] sm:$0xff]   ;;  %v2530_v10 = vld [vmem:[#allocation8 + $0x228] sm:$0xff]  }
 0x147   :  { %2309 = vmatprep.subr.bf16.mxu0 %v2488_v57  ;;  %v2585_v34 = vpop.eup %2584  ;;  %v2522_v57 = vld [vmem:[#allocation8 + $0x218] sm:$0xff]   ;;  %v637_v5 = vadd.f32 %v2888_v52, %v165_v58  ;;  %v2531_v52 = vld [vmem:[#allocation8 + $0x2a8] sm:$0xff]  }
 0x148   :  { %2330 = vmatpush3.bf16.msra.mxu1 %v2487_v54  ;;  %v2520_v54 = vld [vmem:[#allocation8 + $0x258] sm:$0xff]   ;;  %v2545_v20 = vld [vmem:[#allocation8 + $0x3c8] sm:$0xff]  }
 0x149   :  { %2331 = vmatprep.subr.bf16.mxu1 %v2489_v63  ;;  %v2524_v63 = vld [vmem:[#allocation8 + $0x260] sm:$0xff]   ;;  %v2536_v61 = vld [vmem:[#allocation8 + $0x278] sm:$0xff]   ;;  %v2546_v24 = vld [vmem:[#allocation8 + $0x308] sm:$0xff]  }
 0x14a   :  { %2310 = vmatpush3.bf16.msra.mxu0 %v2490_v7  ;;  %v2587_v36 = vpop.eup %2586  ;;  %v690_v7 = vpack.c.bf16 %v2874_v22, %v2874_v22  ;;  %v697_v22 = vpack.c.bf16 %v678_v9, %v678_v9  ;;  %v2129_v1 = vld [vmem:[%s2941_s4] ss:$0 sm:$0xff]  ;;  %s2734_s4 = smov [#allocation10]  }
 0x14b   :  { %2311 = vmatprep.subr.bf16.mxu0 %v2492_v12  ;;  %v2532_v12 = vld [vmem:[#allocation8 + $0x270] sm:$0xff]   ;;  %s2078_s17 = sshll.u32 %s2734_s4, 4  ;;  %s2079_s17 = int_to_ptr.vmem [resolvable:$true] %s2078_s17 }
 0x14c   :  { %2332 = vmatpush3.bf16.msra.mxu1 %v2491_v11  ;;  %v2589_v44 = vpop.eup %2588  ;;  %v695_v11 = vpack.c.bf16 %v637_v5, %v637_v5  ;;  %2592 = vtanh.bf16 %v690_v7  ;;  %s2696_s1 = scalar_lea.vmem %s2079_s17, 128  ;;  %p2701_p5 = scmp.lt.s32.totalorder %s2079_s17, %s2079_s17 }
 0x14d   :  { %2333 = vmatprep.subr.bf16.mxu1 %v2493_v13  ;;  %v2591_v45 = vpop.eup %2590  ;;  %2594 = vtanh.bf16 %v692_v37  ;;  %v2537_v13 = vld [vmem:[#allocation8 + $0x2f8] sm:$0xff]   ;;  %p2697_p4 = scmp.ne.s32.totalorder %s2079_s17, %s2696_s1  ;;  %p2702_p6 = scmp.lt.s32.totalorder %s2696_s1, %s2696_s1 }
 0x14e   :  { %2312 = vmatpush3.bf16.msra.mxu0 %v2494_v14  ;;  %2596 = vtanh.bf16 %v695_v11  ;;  %v2538_v14 = vld [vmem:[#allocation8 + $0x238] sm:$0xff]  }
 0x14f   :  { %2313 = vmatprep.subr.bf16.mxu0 %v2496_v4  ;;  %2598 = vtanh.bf16 %v697_v22  ;;  %p2703_p7 = por %p2702_p6, %p2701_p5 }
 0x150   :  { %2334 = vmatpush3.bf16.msra.mxu1 %v2495_v41  ;;  %v2541_v41 = vld [vmem:[#allocation8 + $0x3c0] sm:$0xff]  }
 0x151   :  { %2335 = vmatprep.subr.bf16.mxu1 %v2497_v19  ;;  %v2543_v19 = vld [vmem:[#allocation8 + $0x380] sm:$0xff]   ;;  %p2704_p8 = pnand %p2703_p7, %p2697_p4 }
 0x152   :  { %2314 = vmatpush3.bf16.msra.mxu0 %v2498_v42  ;;  %v2544_v42 = vld [vmem:[#allocation8 + $0x348] sm:$0xff]  }
 0x153   :  { %2315 = vmatprep.subr.bf16.mxu0 %v2500_v21 }
 0x154   :  { %2336 = vmatpush3.bf16.msra.mxu1 %v2499_v6 }
 0x155   :  { %2337 = vmatprep.subr.bf16.mxu1 %v2501_v23  ;;  %v2547_v23 = vld [vmem:[#allocation8 + $0x388] sm:$0xff]  }
 0x156   :  { %2316 = vmatpush3.bf16.msra.mxu0 %v2502_v25  ;;  %v2548_v25 = vld [vmem:[#allocation8 + $0x350] sm:$0xff]  }
 0x157   :  { %2317 = vmatprep.subr.bf16.mxu0 %v2504_v27  ;;  %v2593_v4 = vpop.eup %2592  ;;  %v2550_v27 = vld [vmem:[#allocation8 + $0x310] sm:$0xff]  }
 0x158   :  { %2338 = vmatpush3.bf16.msra.mxu1 %v2503_v26  ;;  %v2595_v18 = vpop.eup %2594  ;;  %v2549_v26 = vld [vmem:[#allocation8 + $0x3d0] sm:$0xff]  }
 0x159   :  { %2339 = vmatprep.subr.bf16.mxu1 %v2505_v28  ;;  %v2597_v6 = vpop.eup %2596  ;;  %v2551_v28 = vld [vmem:[#allocation8 + $0x390] sm:$0xff]  }
 0x15a   :  { %2318 = vmatpush3.bf16.msra.mxu0 %v2506_v30  ;;  %v2599_v21 = vpop.eup %2598  ;;  %v2552_v30 = vld [vmem:[#allocation8 + $0x358] sm:$0xff]  }
 0x15b   :  { %2347 = vmatprep.subr.bf16.mxu0 %v2508_v32  ;;  %v2554_v32 = vld [vmem:[#allocation8 + $0x318] sm:$0xff]  }
 0x15c   :  { %2340 = vmatpush3.bf16.msra.mxu1 %v2507_v31  ;;  %v2553_v31 = vld [vmem:[#allocation8 + $0x3d8] sm:$0xff]  }
 0x15d   :  { %2369 = vmatprep.subr.bf16.mxu1 %v2509_v33  ;;  %1858 = vmatmul.mubr.bf16.vlgmr.msra.gmra.mrb[20].mxu0 %v2585_v34  ;;  %v2555_v33 = vld [vmem:[#allocation8 + $0x398] sm:$0xff]   ;;  %v2556_v34 = vld [vmem:[#allocation8 + $0x360] sm:$0xff]  }
 0x15e   :  { %2348 = vmatpush3.bf16.msra.mxu0 %v2510_v35  ;;  %1937 = vmatprep.mubr.bf16.mxu0 %v2589_v44  ;;  %v2557_v35 = vld [vmem:[#allocation8 + $0x3e0] sm:$0xff]   ;;  %v2561_v44 = vld [vmem:[#allocation8 + $0x3e8] sm:$0xff]  }
 0x15f   :  { %1898 = vmatmul.mubr.bf16.vlgmr.msra.gmra.mrb[20].mxu1 %v2587_v36  ;;  %2349 = vmatprep.subr.bf16.mxu0 %v2512_v40  ;;  %v2558_v36 = vld [vmem:[#allocation8 + $0x320] sm:$0xff]   ;;  %v2560_v40 = vld [vmem:[#allocation8 + $0x368] sm:$0xff]  }
 0x160   :  { %2370 = vmatpush3.bf16.msra.mxu1 %v2511_v38  ;;  %1977 = vmatprep.mubr.bf16.mxu1 %v2591_v45  ;;  %v2559_v38 = vld [vmem:[#allocation8 + $0x3a0] sm:$0xff]   ;;  %v694_v45 = vpack.c.bf16 %v2886_v51, %v2886_v51  ;;  %v2570_v51 = vld [vmem:[#allocation8 + $0x338] sm:$0xff]  }
 0x161   :  { %2371 = vmatprep.subr.bf16.mxu1 %v2513_v43  ;;  %v696_v43 = vpack.c.bf16 %v2891_v59, %v2891_v59  ;;  %v2567_v59 = vld [vmem:[#allocation8 + $0x3b0] sm:$0xff]  }
 0x162   :  { %2350 = vmatpush3.bf16.msra.mxu0 %v2514_v46  ;;  %v2562_v46 = vld [vmem:[#allocation8 + $0x328] sm:$0xff]  }
 0x163   :  { %2351 = vmatprep.subr.bf16.mxu0 %v2516_v48  ;;  %v2564_v48 = vld [vmem:[#allocation8 + $0x370] sm:$0xff]   ;;  %2600 = vtanh.bf16 %v696_v43 }
 0x164   :  { %2372 = vmatpush3.bf16.msra.mxu1 %v2515_v47  ;;  %v2563_v47 = vld [vmem:[#allocation8 + $0x3a8] sm:$0xff]   ;;  %2602 = vtanh.bf16 %v694_v45 }
 0x165   :  { %2373 = vmatprep.subr.bf16.mxu1 %v2517_v49  ;;  %v2565_v49 = vld [vmem:[#allocation8 + $0x3f0] sm:$0xff]  }
 0x166   :  { %2352 = vmatpush3.bf16.msra.mxu0 %v2518_v50  ;;  %v2566_v50 = vld [vmem:[#allocation8 + $0x330] sm:$0xff]  }
 0x167   :  { %2353 = vmatprep.subr.bf16.mxu0 %v2520_v54  ;;  %v2569_v54 = vld [vmem:[#allocation8 + $0x3f8] sm:$0xff]  }
 0x168   :  { %2374 = vmatpush3.bf16.msra.mxu1 %v2519_v53  ;;  %v2568_v53 = vld [vmem:[#allocation8 + $0x378] sm:$0xff]  }
 0x169   :  { %2375 = vmatprep.subr.bf16.mxu1 %v2521_v56  ;;  %v2571_v56 = vld [vmem:[#allocation8 + $0x3b8] sm:$0xff]  }
 0x16a   :  { %2354 = vmatpush3.bf16.msra.mxu0 %v2522_v57 }
 0x16b   :  { %2355 = vmatprep.subr.bf16.mxu0 %v2524_v63 }
 0x16c   :  { %2376 = vmatpush3.bf16.msra.mxu1 %v2523_v62 }
 0x16d   :  { %2377 = vmatprep.subr.bf16.mxu1 %v2525_v2 }
 0x16e   :  { %2356 = vmatpush3.bf16.msra.mxu0 %v2526_v3  ;;  %v2601_v57 = vpop.eup %2600 }
 0x16f   :  { %2357 = vmatprep.subr.bf16.mxu0 %v2528_v8  ;;  %v2603_v58 = vpop.eup %2602 }
 0x170   :  { %2378 = vmatpush3.bf16.msra.mxu1 %v2527_v55 }
 0x171   :  { %2379 = vmatprep.subr.bf16.mxu1 %v2529_v60 }
 0x172   :  { %2358 = vmatpush3.bf16.msra.mxu0 %v2530_v10 }
 0x173   :  { %2359 = vmatprep.subr.bf16.mxu0 %v2532_v12 }
 0x174   :  { %2380 = vmatpush3.bf16.msra.mxu1 %v2531_v52 }
 0x175   :  { %2381 = vmatprep.subr.bf16.mxu1 %v2533_v39 }
 0x176   :  { %2360 = vmatpush3.bf16.msra.mxu0 %v2534_v0 }
 0x177   :  { %2361 = vmatprep.subr.bf16.mxu0 %v2536_v61 }
 0x178   :  { %2382 = vmatpush3.bf16.msra.mxu1 %v2535_v29 }
 0x179   :  { %2383 = vmatprep.subr.bf16.mxu1 %v2537_v13 }
 0x17a   :  { %2362 = vmatpush3.bf16.msra.mxu0 %v2538_v14 }
 0x17b   :  { %2391 = vmatprep.subr.bf16.mxu0 %v2540_v16 }
 0x17c   :  { %2384 = vmatpush3.bf16.msra.mxu1 %v2539_v15 }
 0x17d   :  { %2413 = vmatprep.subr.bf16.mxu1 %v2541_v41  ;;  %1938 = vmatmul.mubr.bf16.vlgmr.msra.gmra.mrb[24].mxu0 %v2593_v4 }
 0x17e   :  { %2392 = vmatpush3.bf16.msra.mxu0 %v2542_v17  ;;  %2017 = vmatprep.mubr.bf16.mxu0 %v2597_v6 }
 0x17f   :  { %1978 = vmatmul.mubr.bf16.vlgmr.msra.gmra.mrb[24].mxu1 %v2595_v18  ;;  %2393 = vmatprep.subr.bf16.mxu0 %v2544_v42 }
 0x180   :  { %2414 = vmatpush3.bf16.msra.mxu1 %v2543_v19  ;;  %2057 = vmatprep.mubr.bf16.mxu1 %v2599_v21 }
 0x181   :  { %2415 = vmatprep.subr.bf16.mxu1 %v2545_v20 }
 0x182   :  { %2394 = vmatpush3.bf16.msra.mxu0 %v2546_v24 }
 0x183   :  { %2395 = vmatprep.subr.bf16.mxu0 %v2548_v25 }
 0x184   :  { %2416 = vmatpush3.bf16.msra.mxu1 %v2547_v23 }
 0x185   :  { %2417 = vmatprep.subr.bf16.mxu1 %v2549_v26 }
 0x186   :  { %2396 = vmatpush3.bf16.msra.mxu0 %v2550_v27 }
 0x187   :  { %2397 = vmatprep.subr.bf16.mxu0 %v2552_v30 }
 0x188   :  { %2418 = vmatpush3.bf16.msra.mxu1 %v2551_v28 }
 0x189   :  { %2419 = vmatprep.subr.bf16.mxu1 %v2553_v31 }
 0x18a   :  { %2398 = vmatpush3.bf16.msra.mxu0 %v2554_v32 }
 0x18b   :  { %2399 = vmatprep.subr.bf16.mxu0 %v2556_v34 }
 0x18c   :  { %2420 = vmatpush3.bf16.msra.mxu1 %v2555_v33 }
 0x18d   :  { %2421 = vmatprep.subr.bf16.mxu1 %v2557_v35 }
 0x18e   :  { %2400 = vmatpush3.bf16.msra.mxu0 %v2558_v36 }
 0x18f   :  { %2401 = vmatprep.subr.bf16.mxu0 %v2560_v40 }
 0x190   :  { %2422 = vmatpush3.bf16.msra.mxu1 %v2559_v38 }
 0x191   :  { %2423 = vmatprep.subr.bf16.mxu1 %v2561_v44 }
 0x192   :  { %2402 = vmatpush3.bf16.msra.mxu0 %v2562_v46 }
 0x193   :  { %2403 = vmatprep.subr.bf16.mxu0 %v2564_v48 }
 0x194   :  { %2424 = vmatpush3.bf16.msra.mxu1 %v2563_v47 }
 0x195   :  { %2425 = vmatprep.subr.bf16.mxu1 %v2565_v49 }
 0x196   :  { %2404 = vmatpush3.bf16.msra.mxu0 %v2566_v50 }
 0x197   :  { %2405 = vmatprep.subr.bf16.mxu0 %v2568_v53 }
 0x198   :  { %2426 = vmatpush3.bf16.msra.mxu1 %v2567_v59 }
 0x199   :  { %2427 = vmatprep.subr.bf16.mxu1 %v2569_v54 }
 0x19a   :  { %2406 = vmatpush3.bf16.msra.mxu0 %v2570_v51 }
 0x19c   :  { %2428 = vmatpush3.bf16.msra.mxu1 %v2571_v56 }
 0x19d   :  { %2018 = vmatmul.mubr.bf16.vlgmr.msra.gmra.mrb[28].mxu0 %v2603_v58 }
 0x19f   :  { %2058 = vmatmul.mubr.bf16.vlgmr.msra.gmra.mrb[28].mxu1 %v2601_v57 }
 0x210   :  { %v2275_v62 = vpop.f32.mrb[16].mxu0 }
 0x211   :  { %v2276_v2 = vpop.f32.mrb[17].mxu0 }
 0x212   :  { %v2297_v63 = vpop.f32.mrb[16].mxu1  ;;  %v2277_v3 = vadd.f32 %v2276_v2, %v2275_v62  ;;  %v2278_v7 = vpop.f32.mrb[18].mxu0 }
 0x213   :  { %v2298_v5 = vpop.f32.mrb[17].mxu1  ;;  %v2279_v9 = vpop.f32.mrb[19].mxu0 }
 0x214   :  { %v2299_v55 = vadd.f32 %v2298_v5, %v2297_v63  ;;  %v2300_v8 = vpop.f32.mrb[18].mxu1  ;;  %v1780_v37 = vadd.f32 %v2277_v3, %v2129_v1 }
 0x215   :  { %v2301_v60 = vpop.f32.mrb[19].mxu1 }
 0x216   :  { %v1820_v10 = vadd.f32 %v2299_v55, %v1780_v37 }
 0x230   :  { %v2319_v11 = vpop.f32.mrb[20].mxu0 }
 0x231   :  { %v2320_v12 = vpop.f32.mrb[21].mxu0 }
 0x232   :  { %v2341_v52 = vpop.f32.mrb[20].mxu1  ;;  %v2321_v22 = vadd.f32 %v2320_v12, %v2319_v11  ;;  %v2322_v0 = vpop.f32.mrb[22].mxu0 }
 0x233   :  { %v2342_v39 = vpop.f32.mrb[21].mxu1  ;;  %v2323_v13 = vpop.f32.mrb[23].mxu0 }
 0x234   :  { %v2343_v29 = vadd.f32 %v2342_v39, %v2341_v52  ;;  %v2344_v61 = vpop.f32.mrb[22].mxu1  ;;  %v1860_v14 = vadd.f32 %v2321_v22, %v1820_v10 }
 0x235   :  { %v2345_v15 = vpop.f32.mrb[23].mxu1 }
 0x236   :  { %v1900_v16 = vadd.f32 %v2343_v29, %v1860_v14 }
 0x250   :  { %v2363_v41 = vpop.f32.mrb[24].mxu0 }
 0x251   :  { %v2364_v17 = vpop.f32.mrb[25].mxu0 }
 0x252   :  { %v2385_v4 = vpop.f32.mrb[24].mxu1  ;;  %v2365_v18 = vadd.f32 %v2364_v17, %v2363_v41  ;;  %v2366_v42 = vpop.f32.mrb[26].mxu0 }
 0x253   :  { %v2386_v19 = vpop.f32.mrb[25].mxu1  ;;  %v2367_v21 = vpop.f32.mrb[27].mxu0 }
 0x254   :  { %v2387_v20 = vadd.f32 %v2386_v19, %v2385_v4  ;;  %v2388_v6 = vpop.f32.mrb[26].mxu1  ;;  %v1940_v24 = vadd.f32 %v2365_v18, %v1900_v16 }
 0x255   :  { %v2389_v23 = vpop.f32.mrb[27].mxu1 }
 0x256   :  { %v1980_v25 = vadd.f32 %v2387_v20, %v1940_v24 }
 0x270   :  { %v2407_v26 = vpop.f32.mrb[28].mxu0 }
 0x271   :  { %v2408_v28 = vpop.f32.mrb[29].mxu0 }
 0x272   :  { %v2429_v27 = vpop.f32.mrb[28].mxu1  ;;  %v2409_v30 = vadd.f32 %v2408_v28, %v2407_v26  ;;  %v2410_v32 = vpop.f32.mrb[30].mxu0 }
 0x273   :  { %v2430_v31 = vpop.f32.mrb[29].mxu1  ;;  %v2411_v35 = vpop.f32.mrb[31].mxu0 }
 0x274   :  { %v2431_v33 = vadd.f32 %v2430_v31, %v2429_v27  ;;  %v2432_v34 = vpop.f32.mrb[30].mxu1  ;;  %v2020_v36 = vadd.f32 %v2409_v30, %v1980_v25 }
 0x275   :  { %v2433_v38 = vpop.f32.mrb[31].mxu1 }
 0x276   :  { %v2060_v40 = vadd.f32 %v2431_v33, %v2020_v36 }
 0x278   :  { %v2258_v43 = vmul.f32 -1.442695, %v2060_v40 }
 0x27a   :  { %2604 = vpow2.f32 %v2258_v43 }
 0x284   :  { %v2605_v44 = vpop.eup %2604 }
 0x285   :  { %v2068_v45 = vadd.f32 1.0, %v2605_v44 }
 0x287   :  { %2606 = vrcp.f32 %v2068_v45 }
 0x291   :  { %v2607_v46 = vpop.eup %2606 }
 0x292   :  { %2071 = vst [vmem:[#allocation10] sm:$0xff] %v2607_v46 }
 0x293   :  { %2707 = shalt.err (!%p2704_p8)
}
 0x294   :  { %s2708_s20 = scalar_lea.hbm %s2942_s5, 128 }
 0x295   :  { %p2709_p9 = scmp.ne.s32.totalorder %s2942_s5, %s2708_s20  ;;  %p2712_p10 = scmp.lt.u32.totalorder %s2708_s20, %s2942_s5 }
 0x297   :  { %p2714_p11 = pnand %p2712_p10, %p2709_p9 }
 0x299   :  { %2717 = shalt.err (!%p2714_p11)
}
 0x29a   :  { %2081 = dma.vmem_to_hbm [thread:$0]  %s2079_s17, 128, %s2942_s5, [#allocation4]  }
 0x29b   :  { %2724 = dma.done.wait [#allocation4], 128  }
 0x29c   :  { %2725 = vsyncadd [#allocation4], 4294967168 }
 0x29d   :  { %2085 = vsyncpa [#allocation3], 1 }
 0x29e   :  { %2086 = vsyncpa [#allocation6], 1 }
 0x29f   :  { %2087 = vsyncpa [#allocation9], 1 }
 0x2a0   :  { %2088 = vsyncpa [#allocation4], 1 }

</bundles_post_ra>
